<compile_context>
chip_gen: v7x
topology: tpu7x:2x2x1
jax: 0.10.0
libtpu: 0.0.40
codegen_flags: <defaults>
</compile_context>

<pallas_src>
import functools

import jax
import jax.numpy as jnp
from jax.experimental import pallas as pl
from jax.experimental.pallas import tpu as pltpu

_LANE = 128
_SUBLANE = 8


def _bce_kernel(x_ref, y_ref, out_ref, *, n_valid, block_rows, tiles_per_core):
    c = pl.program_id(0)   # core-split axis ("parallel")
    i = pl.program_id(1)   # reduction axis ("arbitrary")

    @pl.when(i == 0)
    def _init():
        out_ref[...] = jnp.zeros_like(out_ref)

    x = x_ref[...].astype(jnp.float32)
    y = y_ref[...].astype(jnp.float32)

    # Numerically stable BCE-with-logits:
    #   loss = max(x, 0) - x*y + log(1 + exp(-|x|))
    # exp argument is <= 0, so no overflow; garbage in padded/OOB rows is
    # discarded by the mask below before it can reach the accumulator.
    loss = jnp.maximum(x, 0.0) - x * y + jnp.log(1.0 + jnp.exp(-jnp.abs(x)))

    # Mask the padded tail and any duplicated (clamped) tile on the second
    # core split via the global element index.
    tile = c * tiles_per_core + i
    row = jax.lax.broadcasted_iota(jnp.int32, x.shape, 0)
    lane = jax.lax.broadcasted_iota(jnp.int32, x.shape, 1)
    idx = (tile * block_rows + row) * _LANE + lane
    loss = jnp.where(idx < n_valid, loss, 0.0)

    # Vector partial sums: fold the (block_rows,128) tile onto a vreg-shaped
    # (8,128) accumulator with pure VALU adds (no cross-lane XLU per tile).
    out_ref[...] += loss.reshape(block_rows // _SUBLANE, _SUBLANE, _LANE).sum(axis=0)


def bce_with_logits_mean(logits, labels, *, block_rows=1024):
    """mean(BCEWithLogits(logits, labels)) over all elements -> f32 scalar."""
    n = int(logits.size)
    x = logits.reshape(-1)
    y = labels.reshape(-1)

    chunk = _SUBLANE * _LANE  # 1024
    n_pad = pl.cdiv(n, chunk) * chunk
    if n_pad != n:
        # Tiny (<1024 elem) alignment pad; padded elements are masked in-kernel.
        x = jnp.pad(x, (0, n_pad - n))
        y = jnp.pad(y, (0, n_pad - n))

    rows = n_pad // _LANE           # multiple of 8
    x2 = x.reshape(rows, _LANE)
    y2 = y.reshape(rows, _LANE)

    # Tile sizing: multiple of 8 sublanes, never larger than the array.
    block_rows = max(_SUBLANE, min(int(block_rows), rows))
    block_rows -= block_rows % _SUBLANE
    total_tiles = pl.cdiv(rows, block_rows)

    n_cores = 2                                  # v7x dual-TC split
    tiles_per_core = pl.cdiv(total_tiles, n_cores)
    last_tile = total_tiles - 1

    def in_map(c, i):
        # Clamp so the DMA never starts past the array; clamped duplicate
        # tiles are fully masked inside the kernel (contribute zero).
        return (jnp.minimum(c * tiles_per_core + i, last_tile), 0)

    kernel = functools.partial(
        _bce_kernel,
        n_valid=n,
        block_rows=block_rows,
        tiles_per_core=tiles_per_core,
    )

    out = pl.pallas_call(
        kernel,
        out_shape=jax.ShapeDtypeStruct((n_cores * _SUBLANE, _LANE), jnp.float32),
        grid_spec=pltpu.PrefetchScalarGridSpec(
            num_scalar_prefetch=0,
            grid=(n_cores, tiles_per_core),
            in_specs=[
                pl.BlockSpec((block_rows, _LANE), in_map),
                pl.BlockSpec((block_rows, _LANE), in_map),
            ],
            out_specs=pl.BlockSpec((_SUBLANE, _LANE), lambda c, i: (c, 0)),
        ),
        compiler_params=pltpu.CompilerParams(
            dimension_semantics=("parallel", "arbitrary")),
    )(x2, y2)

    # Final cross-lane reduce + mean on a tiny (16,128) array in XLA.
    return jnp.sum(out) / jnp.float32(n)


def patchwork_bce_forward(logits, pred, label, scale, *, block_rows=1024):
    """Mirrors patchwork_bce.forward(logits, pred, label, scale)."""
    # TODO(synk): per-element `weight` of BCEWithLogitsLoss not implemented
    # (module is constructed with weight=None, so semantics match).
    del pred, scale  # unused by the original forward
    return bce_with_logits_mean(logits, label, block_rows=block_rows)


def _reference(logits, labels):
    x = logits.astype(jnp.float32).reshape(-1)
    y = labels.astype(jnp.float32).reshape(-1)
    loss = jnp.maximum(x, 0.0) - x * y + jnp.log(1.0 + jnp.exp(-jnp.abs(x)))
    return jnp.mean(loss)


if __name__ == "__main__":
    key = jax.random.PRNGKey(0)
    k1, k2 = jax.random.split(key)
    # NCHW logits and binary labels, small shapes.
    logits = jax.random.normal(k1, (2, 4, 16, 16), dtype=jnp.float32)
    label = (jax.random.uniform(k2, (2, 4, 16, 16)) > 0.5).astype(jnp.float32)
    pred = jax.nn.sigmoid(logits)   # unused by the loss; present for API parity
    scale = 1.0

    loss = patchwork_bce_forward(logits, pred, label, scale)
    loss = jax.block_until_ready(loss)

    ref = jax.block_until_ready(_reference(logits, label))
    assert jnp.allclose(loss, ref, atol=1e-5, rtol=1e-5), (loss, ref)
    print("KERNEL_OK")
</pallas_src>

<mosaic_0001>
module attributes {stable_mosaic.version = 11 : i64} {
  func.func @_bce_kernel(%arg0: i32, %arg1: i32, %arg2: memref<16x128xf32, #tpu.memory_space<vmem>>, %arg3: memref<16x128xf32, #tpu.memory_space<vmem>>, %arg4: memref<8x128xf32, #tpu.memory_space<vmem>>) attributes {dimension_semantics = [#tpu.dimension_semantics<parallel>, #tpu.dimension_semantics<arbitrary>], iteration_bounds = array<i64: 2, 1>, scalar_prefetch = 0 : i64, scratch_operands = 0 : i64, tpu.core_type = #tpu.core_type<tc>, window_params = [{transform_indices = @transform_0, window_bounds = array<i64: 16, 128>}, {transform_indices = @transform_1, window_bounds = array<i64: 16, 128>}, {transform_indices = @transform_2, window_bounds = array<i64: 8, 128>}]} {
    %c0_i32 = arith.constant 0 : i32
    %0 = arith.cmpi eq, %arg1, %c0_i32 : i32
    %1 = arith.extui %0 : i1 to i32
    %c0_i32_0 = arith.constant 0 : i32
    %2 = arith.cmpi ne, %1, %c0_i32_0 : i32
    scf.if %2 {
      %cst_12 = arith.constant 0.000000e+00 : f32
      %36 = vector.broadcast %cst_12 : f32 to vector<8x128xf32>
      %c0_13 = arith.constant 0 : index
      %c0_14 = arith.constant 0 : index
      %37 = vector.load %arg4[%c0_13, %c0_14] : memref<8x128xf32, #tpu.memory_space<vmem>>, vector<8x128xf32>
      tpu.vector_store %arg4[%c0_13, %c0_14], %36 {strides = array<i32>} : memref<8x128xf32, #tpu.memory_space<vmem>>, vector<8x128xf32>,
    } else {
    }
    %c0 = arith.constant 0 : index
    %c0_1 = arith.constant 0 : index
    %3 = vector.load %arg2[%c0, %c0_1] : memref<16x128xf32, #tpu.memory_space<vmem>>, vector<16x128xf32>
    %c0_2 = arith.constant 0 : index
    %c0_3 = arith.constant 0 : index
    %4 = vector.load %arg3[%c0_2, %c0_3] : memref<16x128xf32, #tpu.memory_space<vmem>>, vector<16x128xf32>
    %cst = arith.constant 0.000000e+00 : f32
    %5 = vector.broadcast %cst : f32 to vector<16x128xf32>
    %6 = arith.maximumf %3, %5 : vector<16x128xf32>
    %7 = arith.mulf %3, %4 : vector<16x128xf32>
    %8 = arith.subf %6, %7 : vector<16x128xf32>
    %9 = math.absf %3 : vector<16x128xf32>
    %cst_4 = arith.constant 0.000000e+00 : f32
    %10 = vector.broadcast %cst_4 : f32 to vector<16x128xf32>
    %11 = arith.subf %10, %9 : vector<16x128xf32>
    %12 = math.exp %11 : vector<16x128xf32>
    %cst_5 = arith.constant 1.000000e+00 : f32
    %13 = vector.broadcast %cst_5 : f32 to vector<16x128xf32>
    %14 = arith.addf %13, %12 : vector<16x128xf32>
    %15 = math.log %14 : vector<16x128xf32>
    %16 = arith.addf %8, %15 : vector<16x128xf32>
    %c1_i32 = arith.constant 1 : i32
    %17 = arith.muli %arg0, %c1_i32 : i32
    %18 = arith.addi %17, %arg1 : i32
    %19 = tpu.iota {dimensions = array<i32: 0>} : vector<16x128xi32>
    %20 = tpu.iota {dimensions = array<i32: 1>} : vector<16x128xi32>
    %c16_i32 = arith.constant 16 : i32
    %21 = arith.muli %18, %c16_i32 : i32
    %22 = vector.broadcast %21 : i32 to vector<16x128xi32>
    %23 = arith.addi %22, %19 : vector<16x128xi32>
    %c128_i32 = arith.constant 128 : i32
    %24 = vector.broadcast %c128_i32 : i32 to vector<16x128xi32>
    %25 = arith.muli %23, %24 : vector<16x128xi32>
    %26 = arith.addi %25, %20 : vector<16x128xi32>
    %c2048_i32 = arith.constant 2048 : i32
    %27 = vector.broadcast %c2048_i32 : i32 to vector<16x128xi32>
    %28 = arith.cmpi slt, %26, %27 : vector<16x128xi32>
    %cst_6 = arith.constant 0.000000e+00 : f32
    %29 = vector.broadcast %cst_6 : f32 to vector<16x128xf32>
    %30 = arith.select %28, %16, %29 : vector<16x128xi1>, vector<16x128xf32>
    %c0_7 = arith.constant 0 : index
    %c0_8 = arith.constant 0 : index
    %31 = vector.load %arg4[%c0_7, %c0_8] : memref<8x128xf32, #tpu.memory_space<vmem>>, vector<8x128xf32>
    %32 = vector.shape_cast %30 : vector<16x128xf32> to vector<2x8x128xf32>
    %cst_9 = arith.constant dense<0.000000e+00> : vector<8x128xf32>
    %33 = vector.multi_reduction <add>, %32, %cst_9 [0] : vector<2x8x128xf32> to vector<8x128xf32>
    %34 = arith.addf %31, %33 : vector<8x128xf32>
    %c0_10 = arith.constant 0 : index
    %c0_11 = arith.constant 0 : index
    %35 = vector.load %arg4[%c0_10, %c0_11] : memref<8x128xf32, #tpu.memory_space<vmem>>, vector<8x128xf32>
    tpu.vector_store %arg4[%c0_10, %c0_11], %34 {strides = array<i32>} : memref<8x128xf32, #tpu.memory_space<vmem>>, vector<8x128xf32>,
    return
  }
  func.func @transform_0(%arg0: i32, %arg1: i32) -> (i32, i32) {
    %c1_i32 = arith.constant 1 : i32
    %0 = arith.muli %arg0, %c1_i32 : i32
    %1 = arith.addi %0, %arg1 : i32
    %c0_i32 = arith.constant 0 : i32
    %2 = arith.minsi %1, %c0_i32 : i32
    %c0_i32_0 = arith.constant 0 : i32
    %c0_i32_1 = arith.constant 0 : i32
    return %2, %c0_i32_0 : i32, i32
  }
  func.func @transform_1(%arg0: i32, %arg1: i32) -> (i32, i32) {
    %c1_i32 = arith.constant 1 : i32
    %0 = arith.muli %arg0, %c1_i32 : i32
    %1 = arith.addi %0, %arg1 : i32
    %c0_i32 = arith.constant 0 : i32
    %2 = arith.minsi %1, %c0_i32 : i32
    %c0_i32_0 = arith.constant 0 : i32
    %c0_i32_1 = arith.constant 0 : i32
    return %2, %c0_i32_0 : i32, i32
  }
  func.func @transform_2(%arg0: i32, %arg1: i32) -> (i32, i32) {
    %c0_i32 = arith.constant 0 : i32
    %c0_i32_0 = arith.constant 0 : i32
    return %arg0, %c0_i32 : i32, i32
  }
}

</mosaic_0001>

<bundles_post_ra>
// kernel: tpu_custom_call.1
= control target key start
LH: loop header
LB: loop body
LE: loop exit
PB: predicated region body
PF: predicated region fallthrough
CT: control target
= control target key end

     0   :  { %7 = vsyncpa [#allocation3], 0  ;;  %s924_s0 = inlined_call_operand.hbm [shape: f32[16,128], index: 0, kind: input, shape index: {}]   ;;  %s925_s1 = inlined_call_operand.hbm [shape: f32[16,128], index: 1, kind: input, shape index: {}]   ;;  %s926_s2 = inlined_call_operand.hbm [shape: f32[16,128], index: 2, kind: output, shape index: {}]  }
   0x1   :  { %9 = vsyncpa [#allocation3 + $0x1], 0 }
   0x2   :  { %10 = vsyncpa [#allocation6], 0 }
   0x3   :  { %12 = vsyncpa [#allocation6 + $0x1], 0 }
   0x4   :  { %13 = vsyncpa [#allocation4], 0 }
   0x5   :  { %15 = vsyncpa [#allocation4 + $0x1], 0  ;;  %s720_s9 = smov 0   ;;  %s722_s10 = smov 0  }
   0x6   :  { %s724_s11 = smov 0   ;;  %s726_s12 = smov 0  }
   0x7   :  { %s728_s13 = smov 0   ;;  %s730_s14 = smov 0  }
   0x8   :  { %s732_s15 = smov 0   ;;  %s734_s16 = smov 0  }
   0x9 LB: > { %s408_s17 = sadd.s32 4294967295, %s698_s16   ;;  %s409_s18 = sadd.s32 4294967294, %s698_s16   ;;  %s698_s16 = sphi %s734_s16, %s21_s16   ;;  %s694_s15 = sphi %s732_s15, %s945_s15   ;;  %s690_s14 = sphi %s730_s14, %s944_s14   ;;  %s686_s13 = sphi %s728_s13, %s914_s13   ;;  %s682_s12 = sphi %s726_s12, %s943_s12   ;;  %s678_s11 = sphi %s724_s11, %s942_s11   ;;  %s674_s10 = sphi %s722_s10, %s941_s10   ;;  %s670_s9 = sphi %s720_s9, %s940_s9  }
   0xa   : > { %s33_s19 = sadd.s32 1, %s694_s15  ;;  %p667_p1 = scmp.ne.s32.totalorder %s686_s13, 0 }
   0xb   : > { %p35_p0 = scmp.ge.s32.totalorder %s33_s19, 2  ;;  %p54_p2 = scmp.eq.s32.totalorder %s698_s16, 0 }
   0xc   : > { %p59_p3 = scmp.ne.s32.totalorder %s686_s13, %s682_s12  ;;  %p60_p5 = scmp.eq.s32.totalorder %s408_s17, 0 }
   0xd   : > { %s947_s19 = smov (%p35_p0, %s33_s19), 0  ;;  %p766_p4 = por %p667_p1, %p54_p2 }
   0xe   : > { %p770_p6 = por %p60_p5, %p59_p3  ;;  %s101_s22 = ssub.s32 %s694_s15, %s947_s19 }
   0xf   : > { %p102_p7 = scmp.eq.s32.totalorder %s101_s22, 0  ;;  %s104_s23 = sadd.s32 1, %s678_s11 }
  0x10   : > { %s930_s21 = scalar_select %p770_p6, 1, 0 }
  0x11   : > { %s778_s24 = scalar_select %p102_p7, %s678_s11, %s104_s23  }
  0x12   : > { %p114_p8 = scmp.ne.s32.totalorder %s678_s11, %s674_s10  ;;  %p115_p9 = scmp.eq.s32.totalorder %s408_s17, 1 }
  0x13   : > { %p120_p10 = scmp.ne.s32.totalorder %s674_s10, %s670_s9  ;;  %p121_p11 = scmp.eq.s32.totalorder %s409_s18, 1 }
  0x14   : > { %p784_p12 = por %p115_p9, %p114_p8  ;;  %p446_p1 = scmp.lt.s32.totalorder %s698_s16, 2 }
  0x15   : > { %p789_p0 = por %p121_p11, %p120_p10  ;;  %s700_s27 = smov [#allocation2]  }
  0x16   : > { %s931_s25 = scalar_select %p784_p12, 1, 0 }
  0x17   : > { %s932_s26 = scalar_select %p789_p0, 1, 0 }
  0x18   : > { %s155_s28 = sshll.u32 %s700_s27, 4  ;;  %p796_p2 = pnand %p446_p1, %p766_p4  ;;  %s156_s28 = int_to_ptr.vmem [resolvable:$true] %s155_s28 }
  0x19   : > { %s531_s4 = scalar_lea.hbm %s924_s0, 256 }
  0x1a   : > { %p532_p3 = scmp.ne.s32.totalorder %s924_s0, %s531_s4  ;;  %p533_p5 = pneg %p796_p2 }
  0x1b   : > { %p538_p8 = scmp.lt.u32.totalorder %s531_s4, %s531_s4  ;;  %p540_p9 = scmp.lt.u32.totalorder %s531_s4, %s924_s0 }
  0x1c   : > { %p534_p7 = pnand %p533_p5, %p532_p3 }
  0x1d   : > { %p541_p10 = por %p540_p9, %p538_p8 }
  0x1e   : > { %p535_p4 = pneg %p534_p7 }
  0x20   : > { %p542_p11 = pnand %p541_p10, %p535_p4 }
  0x22   : > { %545 = shalt.err (!%p542_p11)
}
  0x23   : > { %s546_s12 = scalar_lea.vmem %s156_s28, 256  ;;  %s553_s17 = scalar_lea.vmem %s156_s28, 512 }
  0x24   : > { %p547_p1 = scmp.ne.s32.totalorder %s156_s28, %s546_s12  ;;  %p554_p12 = scmp.lt.s32.totalorder %s156_s28, %s156_s28 }
  0x25   : > { %p555_p6 = scmp.lt.s32.totalorder %s553_s17, %s546_s12 }
  0x26   : > { %p549_p13 = pnand %p547_p1, %p533_p5 }
  0x27   : > { %p556_p3 = por %p555_p6, %p554_p12 }
  0x28   : > { %p550_p0 = pneg %p549_p13 }
  0x2a   : > { %p557_p7 = pnand %p556_p3, %p550_p0 }
  0x2c   : > { %560 = shalt.err (!%p557_p7)
}
  0x2d   : > { %s701_s18 = smov 128   ;;  %s702_s20 = smov 8  }
  0x2e   : > { %438 = dma.hbm_to_vmem [thread:$0]  (!%p796_p2), %s924_s0, 256, %s156_s28, [#allocation3], %s701_s18, %s701_s18, %s702_s20  }
  0x2f   : > { %p418_p13 = scmp.ge.s32.totalorder %s698_s16, 1  ;;  %p187_p4 = scmp.lt.s32.totalorder %s698_s16, 3 }
  0x30   : > { %s703_s30 = smov [#allocation5]   ;;  %s561_s6 = scalar_lea.hbm %s925_s1, 256 }
  0x31   : > { %p827_p8 = pnand %p418_p13, %p187_p4  ;;  %s179_s3 = sshll.u32 %s703_s30, 4  ;;  %s180_s3 = int_to_ptr.vmem [resolvable:$true] %s179_s3 }
  0x32   : > { %p562_p6 = scmp.ne.s32.totalorder %s925_s1, %s561_s6  ;;  %p568_p9 = scmp.lt.u32.totalorder %s561_s6, %s561_s6 }
  0x33   : > { %s934_s27 = scalar_select %p827_p8, 1, 0 }
  0x34   : > { %p564_p12 = pnand %p562_p6, %p533_p5  ;;  %p570_p10 = scmp.lt.u32.totalorder %s561_s6, %s925_s1 }
  0x36   : > { %p565_p0 = pneg %p564_p12  ;;  %p571_p11 = por %p570_p10, %p568_p9 }
  0x38   : > { %p572_p1 = pnand %p571_p11, %p565_p0 }
  0x3a   : > { %575 = shalt.err (!%p572_p1)
}
  0x3b   : > { %s576_s17 = scalar_lea.vmem %s180_s3, 256  ;;  %s583_s22 = scalar_lea.vmem %s180_s3, 512 }
  0x3c   : > { %p577_p3 = scmp.ne.s32.totalorder %s180_s3, %s576_s17  ;;  %p584_p4 = scmp.lt.s32.totalorder %s180_s3, %s180_s3 }
  0x3d   : > { %p585_p8 = scmp.lt.s32.totalorder %s583_s22, %s576_s17 }
  0x3e   : > { %p579_p7 = pnand %p577_p3, %p533_p5 }
  0x3f   : > { %p586_p6 = por %p585_p8, %p584_p4 }
  0x40   : > { %p580_p13 = pneg %p579_p7 }
  0x42   : > { %p587_p12 = pnand %p586_p6, %p580_p13 }
  0x44   : > { %590 = shalt.err (!%p587_p12)
}
  0x45   : > { %441 = dma.hbm_to_vmem [thread:$0]  (!%p796_p2), %s925_s1, 256, %s180_s3, [#allocation6], %s701_s18, %s701_s18, %s702_s20  }
  0x46   : > { %p935_p0 = scmp.ne.s32.totalorder %s934_s27, 0 }
  0x47   : > { %s193_s4 = sand.u32 (!%p935_p0), 1, %s686_s13   ;;  %p936_p5 = scmp.ne.s32.totalorder (!%p935_p0), %s930_s21, 0 }
  0x48   : > { %191 = sbr.rel (%p935_p0) target bundleno = 135 (0x87), region = 28  ;;  %s419_s5 = sshll.u32 (!%p935_p0), %s193_s4, 4 }
  0x49   : > { %s194_s6 = scalar_lea.sflag (!%p935_p0), [#allocation3], %s193_s4  ;;  %s197_s7 = scalar_lea.vmem (!%p935_p0), [#allocation2], %s419_s5 }
  0x4f   : > { %656 = dma.done.wait (%p936_p5), %s194_s6, 256  }
  0x50   : > { %658 = vsyncadd (%p936_p5), %s194_s6, 4294967040  ;;  %s203_s29 = scalar_lea.sflag [#allocation6], %s193_s4  ;;  %s206_s8 = scalar_lea.vmem [#allocation5], %s419_s5 }
  0x51   : > { %660 = dma.done.wait (%p936_p5), %s203_s29, 256  }
  0x52   : > { %662 = vsyncadd (%p936_p5), %s203_s29, 4294967040  ;;  %v245_v0 = vld [vmem:[%s197_s7] sm:$0xff]  ;;  %v246_v1 = vld [vmem:[%s197_s7 + $0x8] sm:$0xff]  ;;  %v272_v8 = vlaneseq  ;;  %s422_s18 = sshll.u32 %s690_s14, 4  ;;  %s229_s21 = sand.u32 1, %s674_s10  }
  0x53   : > { %v255_v2 = vand.u32 2147483647, %v245_v0  ;;  %v256_v3 = vand.u32 2147483647, %v246_v1  ;;  %v278_v12 = vstv %s422_s18  ;;  %v247_v18 = vld [vmem:[%s206_s8] sm:$0xff]  ;;  %v248_v19 = vld [vmem:[%s206_s8 + $0x8] sm:$0xff] }
  0x54   : > { %v273_v9 = vshrl.u32 %v272_v8, 7  ;;  %v276_v20 = vand.u32 127, %v272_v8  ;;  %v249_v22 = vmax.f32 %v245_v0, 0.0  ;;  %v251_v23 = vmul.f32 %v247_v18, %v245_v0  ;;  %s421_s20 = sshll.u32 %s229_s21, 3  ;;  %s424_s27 = sshll.u32 %s690_s14, 7 }
  0x55   : > { %v257_v4 = vsub.f32 0.0, %v255_v2  ;;  %v258_v5 = vsub.f32 0.0, %v256_v3  ;;  %v250_v25 = vmax.f32 %v246_v1, 0.0  ;;  %v252_v26 = vmul.f32 %v248_v19, %v246_v1  ;;  %s231_s3 = scalar_lea.vmem [#allocation7], %s421_s20  ;;  %s871_s22 = scalar_lea.hbm %s926_s2, %s424_s27 }
  0x56   : > { %v274_v11 = vadd.s32 8, %v273_v9  ;;  %v279_v16 = vadd.s32 %v278_v12, %v273_v9  ;;  %v253_v28 = vsub.f32 %v249_v22, %v251_v23  ;;  %s307_s28 = sshll.u32 %s231_s3, 4  ;;  %s294_s23 = scalar_lea.sflag [#allocation4], %s229_s21  ;;  %s873_s28 = int_to_ptr.vmem [resolvable:$true] %s307_s28 }
  0x57   : > { %v259_v6 = vmul.f32 1.442695, %v257_v4  ;;  %v261_v7 = vmul.f32 1.442695, %v258_v5  ;;  %v254_v31 = vsub.f32 %v250_v25, %v252_v26  ;;  %s591_s30 = scalar_lea.vmem %s873_s28, 128  ;;  %p937_p8 = scmp.ne.s32.totalorder %s931_s25, 0 }
  0x58   : > { %v280_v17 = vadd.s32 %v278_v12, %v274_v11  ;;  %v281_v21 = vmul.u32 128, %v279_v16  ;;  %p592_p2 = scmp.ne.s32.totalorder %s873_s28, %s591_s30  ;;  %s704_s14 = smov [#allocation7]  }
  0x59   : > { %523 = vpow2.f32 %v259_v6  ;;  %s595_s4 = sshll.u32 %s704_s14, 4  ;;  %s596_s4 = int_to_ptr.vmem [resolvable:$false] %s595_s4 }
  0x5a   : > { %525 = vpow2.f32 %v261_v7  ;;  %v282_v24 = vmul.u32 128, %v280_v17  ;;  %v283_v27 = vadd.s32 %v281_v21, %v276_v20  ;;  %p593_p9 = pnand %p592_p2, %p937_p8  ;;  %s597_s5 = scalar_lea.vmem %s596_s4, 256 }
  0x5b   : > { %p598_p11 = scmp.lt.s32.totalorder %s873_s28, %s596_s4  ;;  %p599_p1 = scmp.lt.s32.totalorder %s597_s5, %s591_s30 }
  0x5c   : > { %v284_v29 = vadd.s32 %v282_v24, %v276_v20  ;;  %vm285_vm0 = vcmp.lt.s32.totalorder %v283_v27, 2048  ;;  %p594_p10 = pneg %p593_p9 }
  0x5d   : > { %p600_p3 = por %p599_p1, %p598_p11 }
  0x5e   : > { %vm286_vm1 = vcmp.lt.s32.totalorder %v284_v29, 2048 }
  0x5f   : > { %p601_p7 = pnand %p600_p3, %p594_p10 }
  0x63   : > { %v524_v10 = vpop.eup %523 }
  0x64   : > { %v526_v13 = vpop.eup %525  ;;  %v263_v14 = vadd.f32 1.0, %v524_v10 }
  0x65   : > { %v264_v15 = vadd.f32 1.0, %v526_v13 }
  0x66   : > { %527 = vlog2.f32 %v263_v14 }
  0x67   : > { %529 = vlog2.f32 %v264_v15 }
  0x70   : > { %v528_v30 = vpop.eup %527 }
  0x71   : > { %v530_v32 = vpop.eup %529  ;;  %v266_v33 = vmul.f32 0.6931472, %v528_v30 }
  0x72   : > { %v268_v34 = vmul.f32 0.6931472, %v530_v32 }
  0x73   : > { %v269_v35 = vadd.f32 %v266_v33, %v253_v28 }
  0x74   : > { %v270_v36 = vadd.f32 %v268_v34, %v254_v31 }
  0x75   : > { %v287_v37 = vsel %vm285_vm0, %v269_v35, 0.0 }
  0x76   : > { %v288_v38 = vsel %vm286_vm1, %v270_v36, 0.0 }
  0x77   : > { %v290_v39 = vadd.f32 %v288_v38, %v287_v37 }
  0x79   : > { %292 = vst [vmem:[%s231_s3] sm:$0xff] %v290_v39 }
  0x7a   : > { %604 = shalt.err (!%p601_p7)
}
  0x7b   : > { %s605_s6 = scalar_lea.hbm %s871_s22, 128  ;;  %s609_s8 = scalar_lea.hbm %s926_s2, 256 }
  0x7c   : > { %p606_p13 = scmp.ne.s32.totalorder %s871_s22, %s605_s6  ;;  %p610_p12 = scmp.lt.u32.totalorder %s871_s22, %s926_s2 }
  0x7d   : > { %p611_p0 = scmp.lt.u32.totalorder %s609_s8, %s605_s6  ;;  %p613_p2 = scmp.lt.u32.totalorder %s605_s6, %s871_s22 }
  0x7e   : > { %p607_p4 = pnand %p606_p13, %p937_p8 }
  0x7f   : > { %p612_p5 = por %p611_p0, %p610_p12 }
  0x80   : > { %p608_p6 = pneg %p607_p4 }
  0x81   : > { %p614_p9 = por %p613_p2, %p612_p5 }
  0x83   : > { %p615_p10 = pnand %p614_p9, %p608_p6 }
  0x85   : > { %618 = shalt.err (!%p615_p10)
}
  0x86   : > { %433 = dma.vmem_to_hbm [thread:$0]  (%p937_p8), %s873_s28, 128, %s871_s22, %s294_s23  }
  0x87 PF: > { %s319_s20 = sand.u32 1, %s670_s9   ;;  %p938_p11 = scmp.ne.s32.totalorder %s932_s26, 0 }
  0x88   : > { %p939_p1 = scmp.ge.s32.totalorder %s698_s16, 2  ;;  %s320_s27 = scalar_lea.sflag [#allocation4], %s319_s20 }
  0x8a   : > { %p443_p3 = pnand %p939_p1, %p938_p11 }
  0x8c   : > { %664 = dma.done.wait (!%p443_p3), %s320_s27, 128  }
  0x8d   : > { %666 = vsyncadd (!%p443_p3), %s320_s27, 4294967168  ;;  %s21_s16 = sadd.s32 1, %s698_s16   ;;  %s940_s9 = smov %s674_s10 }
  0x8e   : > { %p18_p7 = scmp.ge.s32.totalorder %s21_s16, 4   ;;  %s941_s10 = smov %s678_s11 }
  0x8f   : > { %s942_s11 = smov %s778_s24  ;;  %s943_s12 = smov %s686_s13 }
  0x90   : > { %s914_s13 = smov 0   ;;  %s944_s14 = smov %s694_s15 }
  0x91   : > { %s945_s15 = smov %s947_s19  ;;  %20 = sbr.rel (!%p18_p7) target bundleno = 9 (0x9), region = 90 }
  0x98   :  { %325 = vsyncpa [#allocation3], 1 }
  0x99   :  { %327 = vsyncpa [#allocation3 + $0x1], 1 }
  0x9a   :  { %328 = vsyncpa [#allocation6], 1 }
  0x9b   :  { %330 = vsyncpa [#allocation6 + $0x1], 1 }
  0x9c   :  { %331 = vsyncpa [#allocation4], 1 }
  0x9d   :  { %333 = vsyncpa [#allocation4 + $0x1], 1 }

</bundles_post_ra>
